<compile_context>
chip_gen: v7x
topology: tpu7x:2x2x1
jax: 0.10.0
libtpu: 0.0.40
codegen_flags: <defaults>
</compile_context>

<pallas_src>
import numpy as np
import jax
import jax.numpy as jnp
from jax.experimental import pallas as pl
from jax.experimental.pallas import tpu as pltpu


def _round_up(x, m):
    return (x + m - 1) // m * m


# ---------------------------------------------------------------------------
# Fused Pallas kernel: tanh( tanh(x@W1x + a@W1a + b1) @ W2 + b2 )
# ---------------------------------------------------------------------------
def _dynamics_kernel(x_ref, a_ref, w1x_ref, w1a_ref, b1_ref, w2_ref, b2_ref, o_ref):
    h = jnp.dot(x_ref[...], w1x_ref[...], preferred_element_type=jnp.float32)
    h = h + jnp.dot(a_ref[...], w1a_ref[...], preferred_element_type=jnp.float32)
    h = jnp.tanh(h + b1_ref[...])                      # (Bp, Hp), tanh -> EUP
    out = jnp.tanh(
        jnp.dot(h, w2_ref[...], preferred_element_type=jnp.float32) + b2_ref[...]
    )
    o_ref[...] = out.astype(o_ref.dtype)


def dynamics_forward(kparams, x, a):
    """Pallas forward.  x: (B, obs_dim), a: (B, act_dim) -> (B, hidden)."""
    B, obs_dim = x.shape
    _, act_dim = a.shape
    obs_p = kparams["w1x"].shape[0]
    act_p = kparams["w1a"].shape[0]
    Hp = kparams["w2"].shape[1]
    hidden = kparams["hidden"]
    Bp = max(_round_up(B, 8), 8)

    # Only the (tiny) activations are padded per call; weights were padded at init.
    xp = jnp.zeros((Bp, obs_p), jnp.float32).at[:B, :obs_dim].set(x)
    ap = jnp.zeros((Bp, act_p), jnp.float32).at[:B, :act_dim].set(a)

    vmem = pl.BlockSpec(memory_space=pltpu.MemorySpace.VMEM)
    out = pl.pallas_call(
        _dynamics_kernel,
        out_shape=jax.ShapeDtypeStruct((Bp, Hp), jnp.float32),
        in_specs=[vmem] * 7,
        out_specs=vmem,
    )(xp, ap, kparams["w1x"], kparams["w1a"], kparams["b1"],
      kparams["w2"], kparams["b2"])
    return out[:B, :hidden]


# ---------------------------------------------------------------------------
# Parameters: orthogonal init (gain sqrt(2)), zero bias — matching init_ in the module.
# ---------------------------------------------------------------------------
def _orthogonal(key, shape, gain):
    rows, cols = shape
    a = jax.random.normal(key, (max(rows, cols), min(rows, cols)), jnp.float32)
    q, r = jnp.linalg.qr(a)
    q = q * jnp.sign(jnp.diagonal(r))
    if rows < cols:
        q = q.T
    return (gain * q[:rows, :cols]).astype(jnp.float32)


def init_params(key, obs_dim, act_dim, hidden_size=64):
    k1, k2 = jax.random.split(key)
    g = float(np.sqrt(2.0))
    return {
        "w1": _orthogonal(k1, (hidden_size, obs_dim + act_dim), g),  # torch (out, in)
        "b1": jnp.zeros((hidden_size,), jnp.float32),
        "w2": _orthogonal(k2, (hidden_size, hidden_size), g),
        "b2": jnp.zeros((hidden_size,), jnp.float32),
    }


def prepare_kernel_params(params, obs_dim, act_dim, hidden_size):
    """One-time pre-transpose + zero-pad of weights into MXU-friendly (in, out) tiles."""
    obs_p = _round_up(obs_dim, 128)
    act_p = _round_up(act_dim, 128)
    Hp = _round_up(hidden_size, 128)
    w1t = params["w1"].T                 # (obs+act, hidden)
    w1x = w1t[:obs_dim]
    w1a = w1t[obs_dim:]
    kp = {
        "w1x": jnp.zeros((obs_p, Hp), jnp.float32).at[:obs_dim, :hidden_size].set(w1x),
        "w1a": jnp.zeros((act_p, Hp), jnp.float32).at[:act_dim, :hidden_size].set(w1a),
        "b1": jnp.zeros((1, Hp), jnp.float32).at[0, :hidden_size].set(params["b1"]),
        "w2": jnp.zeros((Hp, Hp), jnp.float32)
                 .at[:hidden_size, :hidden_size].set(params["w2"].T),
        "b2": jnp.zeros((1, Hp), jnp.float32).at[0, :hidden_size].set(params["b2"]),
        "hidden": hidden_size,
    }
    return jax.tree_util.tree_map(
        lambda v: jax.device_put(v) if isinstance(v, jnp.ndarray) else v, kp)


# Pure-JAX reference for the correctness check (mirrors the PyTorch module).
def reference_forward(params, x, a):
    z = jnp.concatenate([x, a], axis=-1)
    h = jnp.tanh(z @ params["w1"].T + params["b1"])
    return jnp.tanh(h @ params["w2"].T + params["b2"])


if __name__ == "__main__":
    key = jax.random.PRNGKey(0)
    k_param, k_x, k_a = jax.random.split(key, 3)

    batch, obs_dim, act_dim, hidden = 2, 8, 4, 64   # module default hidden_size=64
    params = init_params(k_param, obs_dim, act_dim, hidden)
    kparams = prepare_kernel_params(params, obs_dim, act_dim, hidden)

    x = jax.random.normal(k_x, (batch, obs_dim), jnp.float32)
    a = jax.random.normal(k_a, (batch, act_dim), jnp.float32)

    out = dynamics_forward(kparams, x, a)
    out = jax.block_until_ready(out)

    assert out.shape == (batch, hidden)
    ref = reference_forward(params, x, a)
    np.testing.assert_allclose(np.asarray(out), np.asarray(ref), rtol=1e-2, atol=1e-2)

    print("KERNEL_OK")
</pallas_src>

<mosaic_0001>
module attributes {stable_mosaic.version = 11 : i64} {
  func.func @_dynamics_kernel(%arg0: memref<8x128xf32, #tpu.memory_space<vmem>>, %arg1: memref<8x128xf32, #tpu.memory_space<vmem>>, %arg2: memref<128x128xf32, #tpu.memory_space<vmem>>, %arg3: memref<128x128xf32, #tpu.memory_space<vmem>>, %arg4: memref<1x128xf32, #tpu.memory_space<vmem>>, %arg5: memref<128x128xf32, #tpu.memory_space<vmem>>, %arg6: memref<1x128xf32, #tpu.memory_space<vmem>>, %arg7: memref<8x128xf32, #tpu.memory_space<vmem>>) attributes {dimension_semantics = [], scalar_prefetch = 0 : i64, scratch_operands = 0 : i64, tpu.core_type = #tpu.core_type<tc>} {
    %c0 = arith.constant 0 : index
    %c0_0 = arith.constant 0 : index
    %0 = vector.load %arg0[%c0, %c0_0] : memref<8x128xf32, #tpu.memory_space<vmem>>, vector<8x128xf32>
    %c0_1 = arith.constant 0 : index
    %c0_2 = arith.constant 0 : index
    %1 = vector.load %arg2[%c0_1, %c0_2] : memref<128x128xf32, #tpu.memory_space<vmem>>, vector<128x128xf32>
    %cst = arith.constant dense<0.000000e+00> : vector<8x128xf32>
    %2 = tpu.matmul %0, %1, %cst {dimension_numbers = #tpu.dot_dimension_numbers<[1], [0], [0], [1], [0, 0, 1, 1], [], []>} : vector<8x128xf32>, vector<128x128xf32>, vector<8x128xf32> -> vector<8x128xf32>
    %c0_3 = arith.constant 0 : index
    %c0_4 = arith.constant 0 : index
    %3 = vector.load %arg1[%c0_3, %c0_4] : memref<8x128xf32, #tpu.memory_space<vmem>>, vector<8x128xf32>
    %c0_5 = arith.constant 0 : index
    %c0_6 = arith.constant 0 : index
    %4 = vector.load %arg3[%c0_5, %c0_6] : memref<128x128xf32, #tpu.memory_space<vmem>>, vector<128x128xf32>
    %cst_7 = arith.constant dense<0.000000e+00> : vector<8x128xf32>
    %5 = tpu.matmul %3, %4, %cst_7 {dimension_numbers = #tpu.dot_dimension_numbers<[1], [0], [0], [1], [0, 0, 1, 1], [], []>} : vector<8x128xf32>, vector<128x128xf32>, vector<8x128xf32> -> vector<8x128xf32>
    %6 = arith.addf %2, %5 : vector<8x128xf32>
    %c0_8 = arith.constant 0 : index
    %c0_9 = arith.constant 0 : index
    %7 = vector.load %arg4[%c0_8, %c0_9] : memref<1x128xf32, #tpu.memory_space<vmem>>, vector<1x128xf32>
    %8 = vector.broadcast %7 : vector<1x128xf32> to vector<8x128xf32>
    %9 = arith.addf %6, %8 : vector<8x128xf32>
    %10 = math.tanh %9 : vector<8x128xf32>
    %c0_10 = arith.constant 0 : index
    %c0_11 = arith.constant 0 : index
    %11 = vector.load %arg5[%c0_10, %c0_11] : memref<128x128xf32, #tpu.memory_space<vmem>>, vector<128x128xf32>
    %cst_12 = arith.constant dense<0.000000e+00> : vector<8x128xf32>
    %12 = tpu.matmul %10, %11, %cst_12 {dimension_numbers = #tpu.dot_dimension_numbers<[1], [0], [0], [1], [0, 0, 1, 1], [], []>} : vector<8x128xf32>, vector<128x128xf32>, vector<8x128xf32> -> vector<8x128xf32>
    %c0_13 = arith.constant 0 : index
    %c0_14 = arith.constant 0 : index
    %13 = vector.load %arg6[%c0_13, %c0_14] : memref<1x128xf32, #tpu.memory_space<vmem>>, vector<1x128xf32>
    %14 = vector.broadcast %13 : vector<1x128xf32> to vector<8x128xf32>
    %15 = arith.addf %12, %14 : vector<8x128xf32>
    %16 = math.tanh %15 : vector<8x128xf32>
    %c0_15 = arith.constant 0 : index
    %c0_16 = arith.constant 0 : index
    %17 = vector.load %arg7[%c0_15, %c0_16] : memref<8x128xf32, #tpu.memory_space<vmem>>, vector<8x128xf32>
    tpu.vector_store %arg7[%c0_15, %c0_16], %16 {strides = array<i32>} : memref<8x128xf32, #tpu.memory_space<vmem>>, vector<8x128xf32>,
    return
  }
}

</mosaic_0001>

<bundles_post_ra>
// kernel: tpu_custom_call.1
= control target key start
LH: loop header
LB: loop body
LE: loop exit
PB: predicated region body
PF: predicated region fallthrough
CT: control target
= control target key end

     0   :  { %12 = vsyncpa [#allocation3], 0  ;;  %s939_s0 = inlined_call_operand.hbm [shape: f32[8,128], index: 0, kind: input, shape index: {}]   ;;  %s940_s1 = inlined_call_operand.hbm [shape: f32[8,128], index: 1, kind: input, shape index: {}]   ;;  %s941_s2 = inlined_call_operand.hbm [shape: f32[128,128], index: 2, kind: input, shape index: {}]   ;;  %s942_s3 = inlined_call_operand.hbm [shape: f32[128,128], index: 3, kind: input, shape index: {}]   ;;  %s943_s4 = inlined_call_operand.vmem [shape: f32[1,128], index: 4, kind: input, shape index: {}]   ;;  %s944_s5 = inlined_call_operand.hbm [shape: f32[128,128], index: 5, kind: input, shape index: {}]   ;;  %s945_s6 = inlined_call_operand.vmem [shape: f32[1,128], index: 6, kind: input, shape index: {}]   ;;  %s946_s7 = inlined_call_operand.hbm [shape: f32[8,128], index: 7, kind: output, shape index: {}]  }
   0x1   :  { %13 = vsyncpa [#allocation6], 0 }
   0x2   :  { %14 = vsyncpa [#allocation9], 0 }
   0x3   :  { %15 = vsyncpa [#allocation4], 0  ;;  %s771_s24 = smov [#allocation5]   ;;  %s631_s28 = scalar_lea.hbm %s940_s1, 128 }
   0x4   :  { %s32_s25 = sshll.u32 %s771_s24, 4  ;;  %p632_p0 = scmp.ne.s32.totalorder %s940_s1, %s631_s28  ;;  %s33_s25 = int_to_ptr.vmem [resolvable:$true] %s32_s25 }
   0x5   :  { %p635_p1 = scmp.lt.u32.totalorder %s631_s28, %s940_s1 }
   0x7   :  { %p637_p2 = pnand %p635_p1, %p632_p0 }
   0x9   :  { %640 = shalt.err (!%p637_p2)
}
   0xa   :  { %s641_s10 = scalar_lea.vmem %s33_s25, 128  ;;  %p646_p4 = scmp.lt.s32.totalorder %s33_s25, %s33_s25 }
   0xb   :  { %p642_p3 = scmp.ne.s32.totalorder %s33_s25, %s641_s10  ;;  %p647_p5 = scmp.lt.s32.totalorder %s641_s10, %s641_s10 }
   0xd   :  { %p648_p6 = por %p647_p5, %p646_p4 }
   0xf   :  { %p649_p7 = pnand %p648_p6, %p642_p3 }
  0x11   :  { %652 = shalt.err (!%p649_p7)
}
  0x12   :  { %35 = dma.hbm_to_vmem [thread:$0]  %s940_s1, 128, %s33_s25, [#allocation6]  }
  0x13   :  { %s772_s13 = smov [#allocation8]   ;;  %s773_s15 = smov [#allocation2]  }
  0x14   :  { %s53_s14 = sshll.u32 %s772_s13, 4  ;;  %s22_s16 = sshll.u32 %s773_s15, 4  ;;  %s54_s14 = int_to_ptr.vmem [resolvable:$true] %s53_s14  ;;  %s23_s16 = int_to_ptr.vmem [resolvable:$true] %s22_s16 }
  0x15   :  { %s653_s19 = scalar_lea.hbm %s942_s3, 2048 }
  0x16   :  { %p654_p8 = scmp.ne.s32.totalorder %s942_s3, %s653_s19  ;;  %p657_p9 = scmp.lt.u32.totalorder %s653_s19, %s942_s3 }
  0x18   :  { %p659_p10 = pnand %p657_p9, %p654_p8 }
  0x1a   :  { %662 = shalt.err (!%p659_p10)
}
  0x1b   :  { %s663_s1 = scalar_lea.vmem %s54_s14, 2048  ;;  %p668_p12 = scmp.lt.s32.totalorder %s54_s14, %s54_s14 }
  0x1c   :  { %p664_p11 = scmp.ne.s32.totalorder %s54_s14, %s663_s1  ;;  %p669_p13 = scmp.lt.s32.totalorder %s663_s1, %s663_s1 }
  0x1e   :  { %p670_p0 = por %p669_p13, %p668_p12 }
  0x20   :  { %p671_p1 = pnand %p670_p0, %p664_p11 }
  0x22   :  { %674 = shalt.err (!%p671_p1)
}
  0x23   :  { %s774_s24 = smov 128   ;;  %s775_s25 = smov 8  }
  0x24   :  { %59 = dma.hbm_to_vmem [thread:$0]  %s942_s3, 2048, %s54_s14, [#allocation9], %s774_s24, %s774_s24, %s775_s25  }
  0x25   :  { %s675_s30 = scalar_lea.hbm %s939_s0, 128 }
  0x26   :  { %p676_p2 = scmp.ne.s32.totalorder %s939_s0, %s675_s30  ;;  %p679_p3 = scmp.lt.u32.totalorder %s675_s30, %s939_s0 }
  0x28   :  { %p681_p4 = pnand %p679_p3, %p676_p2 }
  0x2a   :  { %684 = shalt.err (!%p681_p4)
}
  0x2b   :  { %s685_s12 = scalar_lea.vmem %s23_s16, 128  ;;  %p690_p6 = scmp.lt.s32.totalorder %s23_s16, %s23_s16 }
  0x2c   :  { %p686_p5 = scmp.ne.s32.totalorder %s23_s16, %s685_s12  ;;  %p691_p7 = scmp.lt.s32.totalorder %s685_s12, %s685_s12 }
  0x2e   :  { %p692_p8 = por %p691_p7, %p690_p6 }
  0x30   :  { %p693_p9 = pnand %p692_p8, %p686_p5 }
  0x32   :  { %696 = shalt.err (!%p693_p9)
}
  0x33   :  { %25 = dma.hbm_to_vmem [thread:$0]  %s939_s0, 128, %s23_s16, [#allocation3]  }
  0x34   :  { %s776_s14 = smov [#allocation7]   ;;  %s777_s17 = smov [#allocation10]  }
  0x35   :  { %s41_s15 = sshll.u32 %s776_s14, 4  ;;  %s67_s18 = sshll.u32 %s777_s17, 4  ;;  %s42_s15 = int_to_ptr.vmem [resolvable:$true] %s41_s15  ;;  %s68_s18 = int_to_ptr.vmem [resolvable:$true] %s67_s18 }
  0x36   :  { %s697_s21 = scalar_lea.hbm %s941_s2, 2048 }
  0x37   :  { %p698_p10 = scmp.ne.s32.totalorder %s941_s2, %s697_s21  ;;  %p701_p11 = scmp.lt.u32.totalorder %s697_s21, %s941_s2 }
  0x39   :  { %p703_p12 = pnand %p701_p11, %p698_p10 }
  0x3b   :  { %706 = shalt.err (!%p703_p12)
}
  0x3c   :  { %s707_s0 = scalar_lea.vmem %s42_s15, 2048  ;;  %p712_p0 = scmp.lt.s32.totalorder %s42_s15, %s42_s15 }
  0x3d   :  { %p708_p13 = scmp.ne.s32.totalorder %s42_s15, %s707_s0  ;;  %p713_p1 = scmp.lt.s32.totalorder %s707_s0, %s707_s0 }
  0x3f   :  { %p714_p2 = por %p713_p1, %p712_p0 }
  0x41   :  { %p715_p3 = pnand %p714_p2, %p708_p13 }
  0x43   :  { %718 = shalt.err (!%p715_p3)
}
  0x44   :  { %47 = dma.hbm_to_vmem [thread:$0]  %s941_s2, 2048, %s42_s15, [#allocation6], %s774_s24, %s774_s24, %s775_s25  }
  0x45   :  { %s719_s30 = scalar_lea.hbm %s944_s5, 2048 }
  0x46   :  { %p720_p4 = scmp.ne.s32.totalorder %s944_s5, %s719_s30  ;;  %p723_p5 = scmp.lt.u32.totalorder %s719_s30, %s944_s5 }
  0x48   :  { %p725_p6 = pnand %p723_p5, %p720_p4 }
  0x4a   :  { %728 = shalt.err (!%p725_p6)
}
  0x4b   :  { %s729_s12 = scalar_lea.vmem %s68_s18, 2048  ;;  %p734_p8 = scmp.lt.s32.totalorder %s68_s18, %s68_s18 }
  0x4c   :  { %p730_p7 = scmp.ne.s32.totalorder %s68_s18, %s729_s12  ;;  %p735_p9 = scmp.lt.s32.totalorder %s729_s12, %s729_s12 }
  0x4e   :  { %p736_p10 = por %p735_p9, %p734_p8 }
  0x50   :  { %p737_p11 = pnand %p736_p10, %p730_p7 }
  0x52   :  { %740 = shalt.err (!%p737_p11)
}
  0x53   :  { %73 = dma.hbm_to_vmem [thread:$0]  %s944_s5, 2048, %s68_s18, [#allocation9], %s774_s24, %s774_s24, %s775_s25  }
  0x54   :  { %763 = dma.done.wait [#allocation3], 128  }
  0x55   :  { %764 = vsyncadd [#allocation3], 4294967168 }
  0x56   :  { %765 = dma.done.wait [#allocation6], 2176  }
  0x57   :  { %766 = vsyncadd [#allocation6], 4294965120 }
  0x58   :  { %767 = dma.done.wait [#allocation9], 4096  }
  0x59   :  { %768 = vsyncadd [#allocation9], 4294963200  ;;  %v778_v0 = vmov 0.0|0.0   ;;  %vm779_vm0 = vmmov 0   ;;  %v780_v1 = vmov 0.0   ;;  %v109_v2 = vld [vmem:[#allocation8] sm:$0xff] }
  0x5a   :  { %544 = vmatprep.subr.bf16.mxu0 %v778_v0  ;;  %568 = vmatprep.subr.bf16.mxu1 %v778_v0  ;;  %v110_v3 = vld [vmem:[#allocation8 + $0x8] sm:$0xff]  ;;  %v92_v4 = vld [vmem:[#allocation7] sm:$0xff]  ;;  %v111_v7 = vld [vmem:[#allocation8 + $0x10] sm:$0xff]  ;;  %s781_s14 = smov [#allocation11]  }
  0x5b   :  { %471 = vmatprep.mubr.msk.f32.mxu0 %vm779_vm0, %v780_v1  ;;  %506 = vmatprep.mubr.msk.f32.mxu1 %vm779_vm0, %v780_v1  ;;  %v545_v5 = vpack.c.bf16 %v110_v3, %v109_v2  ;;  %v93_v6 = vld [vmem:[#allocation7 + $0x8] sm:$0xff]  ;;  %v112_v8 = vld [vmem:[#allocation8 + $0x18] sm:$0xff]  ;;  %v94_v10 = vld [vmem:[#allocation7 + $0x10] sm:$0xff]  ;;  %s375_s15 = sshll.u32 %s781_s14, 4  ;;  %s376_s15 = int_to_ptr.vmem [resolvable:$true] %s375_s15 }
  0x5c   :  { %v569_v9 = vpack.c.bf16 %v93_v6, %v92_v4  ;;  %v95_v11 = vld [vmem:[#allocation7 + $0x18] sm:$0xff]  ;;  %v548_v12 = vpack.c.bf16 %v112_v8, %v111_v7  ;;  %v113_v14 = vld [vmem:[#allocation8 + $0x20] sm:$0xff]  ;;  %v114_v15 = vld [vmem:[#allocation8 + $0x28] sm:$0xff]  ;;  %p746_p13 = scmp.lt.s32.totalorder %s376_s15, %s376_s15 }
  0x5d   :  { %546 = vmatpush3.bf16.msra.mxu0 %v545_v5  ;;  %v572_v13 = vpack.c.bf16 %v95_v11, %v94_v10  ;;  %v96_v16 = vld [vmem:[#allocation7 + $0x20] sm:$0xff]  ;;  %v97_v17 = vld [vmem:[#allocation7 + $0x28] sm:$0xff]  ;;  %v551_v18 = vpack.c.bf16 %v114_v15, %v113_v14  ;;  %v115_v20 = vld [vmem:[#allocation8 + $0x30] sm:$0xff] }
  0x5e   :  { %570 = vmatpush3.bf16.msra.mxu1 %v569_v9  ;;  %547 = vmatprep.subr.bf16.mxu0 %v778_v0  ;;  %v575_v19 = vpack.c.bf16 %v97_v17, %v96_v16  ;;  %v116_v21 = vld [vmem:[#allocation8 + $0x38] sm:$0xff]  ;;  %v98_v22 = vld [vmem:[#allocation7 + $0x30] sm:$0xff]  ;;  %v117_v26 = vld [vmem:[#allocation8 + $0x40] sm:$0xff] }
  0x5f   :  { %571 = vmatprep.subr.bf16.mxu1 %v778_v0  ;;  %v99_v23 = vld [vmem:[#allocation7 + $0x38] sm:$0xff]  ;;  %v554_v24 = vpack.c.bf16 %v116_v21, %v115_v20  ;;  %v118_v27 = vld [vmem:[#allocation8 + $0x48] sm:$0xff]  ;;  %v100_v28 = vld [vmem:[#allocation7 + $0x40] sm:$0xff] }
  0x60   :  { %v578_v25 = vpack.c.bf16 %v99_v23, %v98_v22  ;;  %v101_v29 = vld [vmem:[#allocation7 + $0x48] sm:$0xff]  ;;  %v557_v30 = vpack.c.bf16 %v118_v27, %v117_v26  ;;  %v119_v32 = vld [vmem:[#allocation8 + $0x50] sm:$0xff]  ;;  %v120_v33 = vld [vmem:[#allocation8 + $0x58] sm:$0xff] }
  0x61   :  { %549 = vmatpush3.bf16.msra.mxu0 %v548_v12  ;;  %v581_v31 = vpack.c.bf16 %v101_v29, %v100_v28  ;;  %v102_v34 = vld [vmem:[#allocation7 + $0x50] sm:$0xff]  ;;  %v103_v35 = vld [vmem:[#allocation7 + $0x58] sm:$0xff]  ;;  %v560_v36 = vpack.c.bf16 %v120_v33, %v119_v32  ;;  %v121_v38 = vld [vmem:[#allocation8 + $0x60] sm:$0xff] }
  0x62   :  { %573 = vmatpush3.bf16.msra.mxu1 %v572_v13  ;;  %550 = vmatprep.subr.bf16.mxu0 %v778_v0  ;;  %v584_v37 = vpack.c.bf16 %v103_v35, %v102_v34  ;;  %v122_v39 = vld [vmem:[#allocation8 + $0x68] sm:$0xff]  ;;  %v104_v40 = vld [vmem:[#allocation7 + $0x60] sm:$0xff]  ;;  %v123_v44 = vld [vmem:[#allocation8 + $0x70] sm:$0xff] }
  0x63   :  { %574 = vmatprep.subr.bf16.mxu1 %v778_v0  ;;  %v105_v41 = vld [vmem:[#allocation7 + $0x68] sm:$0xff]  ;;  %v563_v42 = vpack.c.bf16 %v122_v39, %v121_v38  ;;  %v124_v45 = vld [vmem:[#allocation8 + $0x78] sm:$0xff]  ;;  %v106_v46 = vld [vmem:[#allocation7 + $0x70] sm:$0xff] }
  0x64   :  { %v587_v43 = vpack.c.bf16 %v105_v41, %v104_v40  ;;  %v107_v47 = vld [vmem:[#allocation7 + $0x78] sm:$0xff]  ;;  %v566_v48 = vpack.c.bf16 %v124_v45, %v123_v44  ;;  %v274_v50 = vld [vmem:[#allocation10] sm:$0xff]  ;;  %v275_v51 = vld [vmem:[#allocation10 + $0x8] sm:$0xff] }
  0x65   :  { %552 = vmatpush3.bf16.msra.mxu0 %v551_v18  ;;  %v590_v49 = vpack.c.bf16 %v107_v47, %v106_v46  ;;  %v108_v52 = vld [vmem:[#allocation5] sm:$0xff]  ;;  %v593_v53 = vpack.c.bf16 %v275_v51, %v274_v50  ;;  %v91_v54 = vld [vmem:[#allocation2] sm:$0xff]  ;;  %v278_v58 = vld [vmem:[#allocation10 + $0x20] sm:$0xff] }
  0x66   :  { %576 = vmatpush3.bf16.msra.mxu1 %v575_v19  ;;  %553 = vmatprep.subr.bf16.mxu0 %v778_v0  ;;  %v276_v55 = vld [vmem:[#allocation10 + $0x10] sm:$0xff]  ;;  %v277_v56 = vld [vmem:[#allocation10 + $0x18] sm:$0xff]  ;;  %v279_v59 = vld [vmem:[#allocation10 + $0x28] sm:$0xff] }
  0x67   :  { %577 = vmatprep.subr.bf16.mxu1 %v778_v0  ;;  %v596_v57 = vpack.c.bf16 %v277_v56, %v276_v55  ;;  %v599_v60 = vpack.c.bf16 %v279_v59, %v278_v58  ;;  %v280_v61 = vld [vmem:[#allocation10 + $0x30] sm:$0xff]  ;;  %v281_v62 = vld [vmem:[#allocation10 + $0x38] sm:$0xff]  ;;  %v282_v2 = vld [vmem:[#allocation10 + $0x40] sm:$0xff] }
  0x68   :  { %v602_v63 = vpack.c.bf16 %v281_v62, %v280_v61  ;;  %v283_v3 = vld [vmem:[#allocation10 + $0x48] sm:$0xff]  ;;  %v285_v5 = vld [vmem:[#allocation10 + $0x58] sm:$0xff]  ;;  %v286_v7 = vld [vmem:[#allocation10 + $0x60] sm:$0xff] }
  0x69   :  { %555 = vmatpush3.bf16.msra.mxu0 %v554_v24  ;;  %v605_v4 = vpack.c.bf16 %v283_v3, %v282_v2  ;;  %v287_v8 = vld [vmem:[#allocation10 + $0x68] sm:$0xff]  ;;  %v288_v10 = vld [vmem:[#allocation10 + $0x70] sm:$0xff]  ;;  %v289_v11 = vld [vmem:[#allocation10 + $0x78] sm:$0xff] }
  0x6a   :  { %579 = vmatpush3.bf16.msra.mxu1 %v578_v25  ;;  %556 = vmatprep.subr.bf16.mxu0 %v778_v0  ;;  %v611_v9 = vpack.c.bf16 %v287_v8, %v286_v7  ;;  %v614_v12 = vpack.c.bf16 %v289_v11, %v288_v10  ;;  %v386_v15 = vld [vmem:[%s943_s4] ss:$0 sm:$0xff]  ;;  %s741_s4 = scalar_lea.vmem %s376_s15, 128 }
  0x6b   :  { %580 = vmatprep.subr.bf16.mxu1 %v778_v0  ;;  %v387_v21 = vld [vmem:[%s945_s6] ss:$0 sm:$0xff]  ;;  %p742_p12 = scmp.ne.s32.totalorder %s376_s15, %s741_s4  ;;  %p747_p0 = scmp.lt.s32.totalorder %s741_s4, %s741_s4 }
  0x6d   :  { %558 = vmatpush3.bf16.msra.mxu0 %v557_v30  ;;  %p748_p1 = por %p747_p0, %p746_p13 }
  0x6e   :  { %582 = vmatpush3.bf16.msra.mxu1 %v581_v31  ;;  %559 = vmatprep.subr.bf16.mxu0 %v778_v0 }
  0x6f   :  { %583 = vmatprep.subr.bf16.mxu1 %v778_v0  ;;  %p749_p2 = pnand %p748_p1, %p742_p12 }
  0x71   :  { %561 = vmatpush3.bf16.msra.mxu0 %v560_v36 }
  0x72   :  { %585 = vmatpush3.bf16.msra.mxu1 %v584_v37  ;;  %562 = vmatprep.subr.bf16.mxu0 %v778_v0 }
  0x73   :  { %586 = vmatprep.subr.bf16.mxu1 %v778_v0 }
  0x75   :  { %564 = vmatpush3.bf16.msra.mxu0 %v563_v42 }
  0x76   :  { %588 = vmatpush3.bf16.msra.mxu1 %v587_v43  ;;  %565 = vmatprep.subr.bf16.mxu0 %v778_v0 }
  0x77   :  { %589 = vmatprep.subr.bf16.mxu1 %v778_v0 }
  0x79   :  { %567 = vmatpush3.bf16.msra.mxu0 %v566_v48 }
  0x7a   :  { %591 = vmatpush3.bf16.msra.mxu1 %v590_v49  ;;  %592 = vmatprep.subr.bf16.mxu0 %v778_v0 }
  0x7c   :  { %472 = vmatmul.mubr.f32.vlgmr.msra.gmra.mrb[0].mxu0 %v108_v52 }
  0x7d   :  { %507 = vmatmul.mubr.f32.vlgmr.msra.gmra.mrb[0].mxu1 %v91_v54  ;;  %594 = vmatpush3.bf16.msra.mxu0 %v593_v53 }
  0x7e   :  { %595 = vmatprep.subr.bf16.mxu0 %v778_v0  ;;  %541 = vmatprep.mubr.msk.f32.mxu0 %vm779_vm0, %v780_v1  ;;  %v284_v1 = vld [vmem:[#allocation10 + $0x50] sm:$0xff] }
  0x7f   :  { %v608_v6 = vpack.c.bf16 %v285_v5, %v284_v1 }
  0x81   :  { %597 = vmatpush3.bf16.msra.mxu0 %v596_v57 }
  0x82   :  { %598 = vmatprep.subr.bf16.mxu0 %v778_v0 }
  0x85   :  { %600 = vmatpush3.bf16.msra.mxu0 %v599_v60 }
  0x86   :  { %601 = vmatprep.subr.bf16.mxu0 %v778_v0 }
  0x89   :  { %603 = vmatpush3.bf16.msra.mxu0 %v602_v63 }
  0x8a   :  { %604 = vmatprep.subr.bf16.mxu0 %v778_v0 }
  0x8d   :  { %606 = vmatpush3.bf16.msra.mxu0 %v605_v4 }
  0x8e   :  { %607 = vmatprep.subr.bf16.mxu0 %v778_v0 }
  0x91   :  { %609 = vmatpush3.bf16.msra.mxu0 %v608_v6 }
  0x92   :  { %610 = vmatprep.subr.bf16.mxu0 %v778_v0 }
  0x95   :  { %612 = vmatpush3.bf16.msra.mxu0 %v611_v9 }
  0x96   :  { %613 = vmatprep.subr.bf16.mxu0 %v778_v0 }
  0x99   :  { %615 = vmatpush3.bf16.msra.mxu0 %v614_v12 }
 0x14f   :  { %v191_v13 = vpop.f32.mrb[0].mxu0 }
 0x150   :  { %v261_v14 = vpop.f32.mrb[0].mxu1  ;;  %v473_v16 = vpop.f32.mrb[1].mxu0 }
 0x151   :  { %v262_v17 = vadd.f32 %v261_v14, %v191_v13  ;;  %v508_v18 = vpop.f32.mrb[1].mxu1 }
 0x153   :  { %v272_v19 = vadd.f32 %v386_v15, %v262_v17 }
 0x155   :  { %627 = vtanh.f32 %v272_v19 }
 0x15f   :  { %v628_v20 = vpop.eup %627 }
 0x160   :  { %542 = vmatmul.mubr.f32.vlgmr.msra.gmra.mrb[2].mxu0 %v628_v20 }
 0x233   :  { %v363_v22 = vpop.f32.mrb[2].mxu0 }
 0x234   :  { %v364_v0 = vadd.f32 %v387_v21, %v363_v22  ;;  %v543_v23 = vpop.f32.mrb[3].mxu0 }
 0x236   :  { %629 = vtanh.f32 %v364_v0 }
 0x240   :  { %v630_v24 = vpop.eup %629 }
 0x241   :  { %368 = vst [vmem:[#allocation11] sm:$0xff] %v630_v24 }
 0x242   :  { %752 = shalt.err (!%p749_p2)
}
 0x243   :  { %s753_s6 = scalar_lea.hbm %s946_s7, 128 }
 0x244   :  { %p754_p3 = scmp.ne.s32.totalorder %s946_s7, %s753_s6  ;;  %p757_p4 = scmp.lt.u32.totalorder %s753_s6, %s946_s7 }
 0x246   :  { %p759_p5 = pnand %p757_p4, %p754_p3 }
 0x248   :  { %762 = shalt.err (!%p759_p5)
}
 0x249   :  { %378 = dma.vmem_to_hbm [thread:$0]  %s376_s15, 128, %s946_s7, [#allocation4]  }
 0x24a   :  { %769 = dma.done.wait [#allocation4], 128  }
 0x24b   :  { %770 = vsyncadd [#allocation4], 4294967168 }
 0x24c   :  { %382 = vsyncpa [#allocation3], 1 }
 0x24d   :  { %383 = vsyncpa [#allocation6], 1 }
 0x24e   :  { %384 = vsyncpa [#allocation9], 1 }
 0x24f   :  { %385 = vsyncpa [#allocation4], 1 }

</bundles_post_ra>
